<compile_context>
chip_gen: v7x
topology: tpu7x:2x2x1
jax: 0.10.0
libtpu: 0.0.40
codegen_flags: <defaults>
</compile_context>

<pallas_src>
from functools import partial

import jax
import jax.numpy as jnp
from jax.experimental import pallas as pl
from jax.experimental.pallas import tpu as pltpu

_TILE_C = 512  # lane-dense: 4 * 128
_TILE_R = 512  # sublane-dense: 64 * 8  -> 512*512 f32 = 1 MiB per buffer


def _identity_kernel(x_ref, o_ref):
    # Whole-tile copy: the only "compute" implied by an empty forward pass.
    o_ref[...] = x_ref[...]


@jax.jit
def _identity_copy(x):
    """Exact identity of `x` via a tiled, pipelined Pallas copy kernel."""
    orig_shape = x.shape
    total = x.size

    # Flatten to a lane/sublane-dense 2-D slab: cols = 512 (multiple of 128),
    # rows padded up to a multiple of the (8-aligned) row tile.
    cols = _TILE_C
    rows = pl.cdiv(total, cols)
    tile_r = min(_TILE_R, pl.cdiv(rows, 8) * 8)        # multiple of 8, <= 512
    rows_padded = pl.cdiv(rows, tile_r) * tile_r
    padded_total = rows_padded * cols

    flat = x.reshape(total)
    if padded_total != total:
        flat = jnp.pad(flat, (0, padded_total - total))
    slab = flat.reshape(rows_padded, cols)

    out = pl.pallas_call(
        _identity_kernel,
        out_shape=jax.ShapeDtypeStruct((rows_padded, cols), x.dtype),
        grid_spec=pltpu.PrefetchScalarGridSpec(
            num_scalar_prefetch=0,
            grid=(rows_padded // tile_r,),
            in_specs=[pl.BlockSpec((tile_r, cols), lambda i: (i, 0))],
            out_specs=pl.BlockSpec((tile_r, cols), lambda i: (i, 0)),
        ),
        compiler_params=pltpu.CompilerParams(
            dimension_semantics=("parallel",),
        ),
        # Identity copy: let the output reuse the input slab's HBM buffer.
        input_output_aliases={0: 0},
    )(slab)

    return out.reshape(padded_total)[:total].reshape(orig_shape)


class MyModelPallas:
    """JAX/Pallas counterpart of the (empty) PyTorch MyModel."""

    def __init__(self):
        # Reference __init__ defines no parameters.
        pass

    def forward(self, x):
        # x: [N, C, H, W] float32 (NCHW, matching PyTorch convention).
        y = _identity_copy(x)
        # Reference forward() returns None; expose the kernel result too so
        # callers can verify the Pallas path actually ran.
        return None, y


if __name__ == "__main__":
    key = jax.random.PRNGKey(0)
    x = jax.random.normal(key, (2, 4, 16, 16), dtype=jnp.float32)

    model = MyModelPallas()
    out, kernel_result = model.forward(x)

    kernel_result = jax.block_until_ready(kernel_result)

    # Semantics check: reference forward returns None.
    assert out is None
    # Kernel sanity check: identity copy matches input exactly.
    assert bool(jnp.array_equal(kernel_result, x))

    print("KERNEL_OK")
</pallas_src>

<mosaic_0001>
module attributes {stable_mosaic.version = 11 : i64} {
  func.func @_identity_kernel(%arg0: i32, %arg1: memref<8x512xf32, #tpu.memory_space<vmem>>, %arg2: memref<8x512xf32, #tpu.memory_space<vmem>>) attributes {dimension_semantics = [#tpu.dimension_semantics<parallel>], iteration_bounds = array<i64: 1>, scalar_prefetch = 0 : i64, scratch_operands = 0 : i64, tpu.core_type = #tpu.core_type<tc>, window_params = [{transform_indices = @transform_0, window_bounds = array<i64: 8, 512>}, {transform_indices = @transform_1, window_bounds = array<i64: 8, 512>}]} {
    %c0 = arith.constant 0 : index
    %c0_0 = arith.constant 0 : index
    %0 = vector.load %arg1[%c0, %c0_0] : memref<8x512xf32, #tpu.memory_space<vmem>>, vector<8x512xf32>
    %c0_1 = arith.constant 0 : index
    %c0_2 = arith.constant 0 : index
    %1 = vector.load %arg2[%c0_1, %c0_2] : memref<8x512xf32, #tpu.memory_space<vmem>>, vector<8x512xf32>
    tpu.vector_store %arg2[%c0_1, %c0_2], %0 {strides = array<i32>} : memref<8x512xf32, #tpu.memory_space<vmem>>, vector<8x512xf32>,
    return
  }
  func.func @transform_0(%arg0: i32) -> (i32, i32) {
    %c0_i32 = arith.constant 0 : i32
    %c0_i32_0 = arith.constant 0 : i32
    return %arg0, %c0_i32 : i32, i32
  }
  func.func @transform_1(%arg0: i32) -> (i32, i32) {
    %c0_i32 = arith.constant 0 : i32
    %c0_i32_0 = arith.constant 0 : i32
    return %arg0, %c0_i32 : i32, i32
  }
}

</mosaic_0001>

<bundles_post_ra>
// kernel: _identity_copy.1
= control target key start
LH: loop header
LB: loop body
LE: loop exit
PB: predicated region body
PF: predicated region fallthrough
CT: control target
= control target key end

     0   :  { %s54_s0 = inlined_call_operand.vmem [shape: f32[8,512], index: 0, kind: input, shape index: {}, may-alias: {0,1}]   ;;  %s55_s1 = inlined_call_operand.vmem [shape: f32[8,512], index: 1, kind: output, shape index: {}, may-alias: {0,1}]  }
   0x1   :  { %v8_v0 = vld [vmem:[%s54_s0] sm:$0xff]  ;;  %v9_v1 = vld [vmem:[%s54_s0 + $0x8] sm:$0xff]  ;;  %v10_v2 = vld [vmem:[%s54_s0 + $0x10] sm:$0xff] }
   0x2   :  { %12 = vst [vmem:[%s55_s1] sm:$0xff] %v8_v0  ;;  %13 = vst [vmem:[%s55_s1 + $0x8] sm:$0xff] %v9_v1 }
   0x3   :  { %14 = vst [vmem:[%s55_s1 + $0x10] sm:$0xff] %v10_v2 }
   0xa   :  { %v11_v3 = vld [vmem:[%s54_s0 + $0x18] sm:$0xff] }
   0xb   :  { %15 = vst [vmem:[%s55_s1 + $0x18] sm:$0xff] %v11_v3 }

</bundles_post_ra>
